<compile_context>
chip_gen: v7x
topology: tpu7x:2x2x1
jax: 0.10.0
libtpu: 0.0.40
codegen_flags: <defaults>
</compile_context>

<pallas_src>
import functools

import jax
import jax.numpy as jnp
from jax import lax
from jax.experimental import pallas as pl
from jax.experimental.pallas import tpu as pltpu

_LANES = 128
_MAX_TILE_ROWS = 512  # 512x128 f32 = 256 KiB/block; 2 inputs x 2 bufs = 1 MiB


def _round_up(x, m):
    return ((x + m - 1) // m) * m


def _pick_tiling(rows_valid):
    """Return (tile_rows, rows_padded); tile_rows is a multiple of 8."""
    if rows_valid <= _MAX_TILE_ROWS:
        t = _round_up(max(rows_valid, 1), 8)
        return t, t
    if rows_valid % 8 == 0:
        # Prefer a large tile that divides the row count exactly: zero padding,
        # so already-aligned inputs never pay an extra HBM pass.
        for t in range(_MAX_TILE_ROWS, 255, -8):
            if rows_valid % t == 0:
                return t, rows_valid
    t = _MAX_TILE_ROWS
    return t, _round_up(rows_valid, t)


def _charbonnier_kernel(x1_ref, x2_ref, out_ref, *, eps_sq, tile_rows,
                        n_valid, need_mask):
    d = x1_ref[...].astype(jnp.float32) - x2_ref[...].astype(jnp.float32)
    v = jnp.sqrt(d * d + jnp.float32(eps_sq))  # sqrt -> EUP slot, free vs HBM
    if need_mask:
        # Zero the contribution of padded elements (exact, no eps correction).
        i = pl.program_id(0)
        row = lax.broadcasted_iota(jnp.int32, v.shape, 0)
        lane = lax.broadcasted_iota(jnp.int32, v.shape, 1)
        idx = (i * tile_rows + row) * _LANES + lane
        v = jnp.where(idx < n_valid, v, jnp.float32(0.0))
    # Vreg-wise partial sums down to one (8, 128) block: pure VPU adds,
    # no cross-lane/XLU reduction inside the kernel.
    out_ref[0] = v.reshape(tile_rows // 8, 8, _LANES).sum(axis=0)


def charbonnier_loss(x1, x2, eps=1e-3):
    """Pallas TPU implementation of CharbonnierLoss.forward."""
    assert x1.shape == x2.shape, "x1/x2 must have matching shapes"
    n_valid = x1.size
    out_dtype = jnp.promote_types(x1.dtype, x2.dtype)

    rows_valid = -(-n_valid // _LANES)  # cdiv
    tile_rows, rows_padded = _pick_tiling(rows_valid)
    n_padded = rows_padded * _LANES
    pad = n_padded - n_valid
    n_tiles = rows_padded // tile_rows

    x1f = jnp.ravel(x1)
    x2f = jnp.ravel(x2)
    if pad:
        # Only non-tile-aligned shapes pay this extra pass; padded elements are
        # masked to zero inside the kernel so the result stays exact.
        # TODO(synk): a manual-DMA (memory_space=pl.ANY) variant could stream a
        # ragged tail without materializing padded copies at all.
        x1f = jnp.pad(x1f, (0, pad))
        x2f = jnp.pad(x2f, (0, pad))
    x1f = x1f.reshape(rows_padded, _LANES)
    x2f = x2f.reshape(rows_padded, _LANES)

    kernel = functools.partial(
        _charbonnier_kernel,
        eps_sq=float(eps) ** 2,
        tile_rows=tile_rows,
        n_valid=n_valid,
        need_mask=pad > 0,
    )

    partials = pl.pallas_call(
        kernel,
        out_shape=jax.ShapeDtypeStruct((n_tiles, 8, _LANES), jnp.float32),
        grid_spec=pltpu.PrefetchScalarGridSpec(
            num_scalar_prefetch=0,
            grid=(n_tiles,),
            in_specs=[
                pl.BlockSpec((tile_rows, _LANES), lambda i: (i, 0)),
                pl.BlockSpec((tile_rows, _LANES), lambda i: (i, 0)),
            ],
            out_specs=pl.BlockSpec((1, 8, _LANES), lambda i: (i, 0, 0)),
        ),
        compiler_params=pltpu.CompilerParams(
            dimension_semantics=("parallel",),  # independent tiles -> 2 TCs on v7x
        ),
    )(x1f, x2f)

    total = jnp.sum(partials)  # tiny (n_tiles, 8, 128) f32 reduction in JAX
    return (total / jnp.float32(n_valid)).astype(out_dtype)


if __name__ == "__main__":
    key = jax.random.PRNGKey(0)
    k1, k2 = jax.random.split(key)
    # NCHW, matching the PyTorch module's expected image-like inputs.
    x1 = jax.random.normal(k1, (2, 4, 16, 16), dtype=jnp.float32)
    x2 = jax.random.normal(k2, (2, 4, 16, 16), dtype=jnp.float32)

    out = jax.block_until_ready(charbonnier_loss(x1, x2))

    # Reference check in plain JAX.
    ref = jnp.mean(jnp.sqrt((x1 - x2) ** 2 + 1e-3 ** 2))
    assert jnp.allclose(out, ref, rtol=1e-5, atol=1e-6), (out, ref)

    print("KERNEL_OK")
</pallas_src>

<mosaic_0001>
module attributes {stable_mosaic.version = 11 : i64} {
  func.func @_charbonnier_kernel(%arg0: i32, %arg1: memref<16x128xf32, #tpu.memory_space<vmem>>, %arg2: memref<16x128xf32, #tpu.memory_space<vmem>>, %arg3: memref<1x8x128xf32, #tpu.memory_space<vmem>>) attributes {dimension_semantics = [#tpu.dimension_semantics<parallel>], iteration_bounds = array<i64: 1>, scalar_prefetch = 0 : i64, scratch_operands = 0 : i64, tpu.core_type = #tpu.core_type<tc>, window_params = [{transform_indices = @transform_0, window_bounds = array<i64: 16, 128>}, {transform_indices = @transform_1, window_bounds = array<i64: 16, 128>}, {transform_indices = @transform_2, window_bounds = array<i64: 1, 8, 128>}]} {
    %c0 = arith.constant 0 : index
    %c0_0 = arith.constant 0 : index
    %0 = vector.load %arg1[%c0, %c0_0] : memref<16x128xf32, #tpu.memory_space<vmem>>, vector<16x128xf32>
    %c0_1 = arith.constant 0 : index
    %c0_2 = arith.constant 0 : index
    %1 = vector.load %arg2[%c0_1, %c0_2] : memref<16x128xf32, #tpu.memory_space<vmem>>, vector<16x128xf32>
    %2 = arith.subf %0, %1 : vector<16x128xf32>
    %3 = arith.mulf %2, %2 : vector<16x128xf32>
    %cst = arith.constant 9.99999997E-7 : f32
    %4 = vector.broadcast %cst : f32 to vector<16x128xf32>
    %5 = arith.addf %3, %4 : vector<16x128xf32>
    %6 = math.sqrt %5 : vector<16x128xf32>
    %7 = vector.shape_cast %6 : vector<16x128xf32> to vector<2x8x128xf32>
    %cst_3 = arith.constant dense<0.000000e+00> : vector<8x128xf32>
    %8 = vector.multi_reduction <add>, %7, %cst_3 [0] : vector<2x8x128xf32> to vector<8x128xf32>
    %c0_4 = arith.constant 0 : index
    %c0_5 = arith.constant 0 : index
    %c0_6 = arith.constant 0 : index
    %9 = vector.load %arg3[%c0_4, %c0_5, %c0_6] : memref<1x8x128xf32, #tpu.memory_space<vmem>>, vector<1x8x128xf32>
    %10 = vector.shape_cast %9 : vector<1x8x128xf32> to vector<8x128xf32>
    %11 = vector.shape_cast %8 : vector<8x128xf32> to vector<1x8x128xf32>
    tpu.vector_store %arg3[%c0_4, %c0_5, %c0_6], %11 {strides = array<i32>} : memref<1x8x128xf32, #tpu.memory_space<vmem>>, vector<1x8x128xf32>,
    return
  }
  func.func @transform_0(%arg0: i32) -> (i32, i32) {
    %c0_i32 = arith.constant 0 : i32
    %c0_i32_0 = arith.constant 0 : i32
    return %arg0, %c0_i32 : i32, i32
  }
  func.func @transform_1(%arg0: i32) -> (i32, i32) {
    %c0_i32 = arith.constant 0 : i32
    %c0_i32_0 = arith.constant 0 : i32
    return %arg0, %c0_i32 : i32, i32
  }
  func.func @transform_2(%arg0: i32) -> (i32, i32, i32) {
    %c0_i32 = arith.constant 0 : i32
    %c0_i32_0 = arith.constant 0 : i32
    %c0_i32_1 = arith.constant 0 : i32
    return %arg0, %c0_i32, %c0_i32_0 : i32, i32, i32
  }
}

</mosaic_0001>

<bundles_post_ra>
// kernel: tpu_custom_call.1
= control target key start
LH: loop header
LB: loop body
LE: loop exit
PB: predicated region body
PF: predicated region fallthrough
CT: control target
= control target key end

     0   :  { %7 = vsyncpa [#allocation3], 0  ;;  %s219_s0 = inlined_call_operand.hbm [shape: f32[16,128], index: 0, kind: input, shape index: {}]   ;;  %s220_s1 = inlined_call_operand.hbm [shape: f32[16,128], index: 1, kind: input, shape index: {}]   ;;  %s221_s2 = inlined_call_operand.hbm [shape: f32[1,8,128], index: 2, kind: output, shape index: {}]  }
   0x1   :  { %8 = vsyncpa [#allocation6], 0 }
   0x2   :  { %9 = vsyncpa [#allocation4], 0  ;;  %s163_s9 = smov [#allocation2]   ;;  %s91_s13 = scalar_lea.hbm %s219_s0, 256 }
   0x3   :  { %s15_s10 = sshll.u32 %s163_s9, 4  ;;  %p92_p0 = scmp.ne.s32.totalorder %s219_s0, %s91_s13  ;;  %s16_s10 = int_to_ptr.vmem [resolvable:$true] %s15_s10 }
   0x4   :  { %p95_p1 = scmp.lt.u32.totalorder %s91_s13, %s219_s0 }
   0x6   :  { %p97_p2 = pnand %p95_p1, %p92_p0 }
   0x8   :  { %100 = shalt.err (!%p97_p2)
}
   0x9   :  { %s101_s18 = scalar_lea.vmem %s16_s10, 256  ;;  %p106_p4 = scmp.lt.s32.totalorder %s16_s10, %s16_s10 }
   0xa   :  { %p102_p3 = scmp.ne.s32.totalorder %s16_s10, %s101_s18  ;;  %p107_p5 = scmp.lt.s32.totalorder %s101_s18, %s101_s18 }
   0xc   :  { %p108_p6 = por %p107_p5, %p106_p4 }
   0xe   :  { %p109_p7 = pnand %p108_p6, %p102_p3 }
  0x10   :  { %112 = shalt.err (!%p109_p7)
}
  0x11   :  { %s164_s19 = smov 128   ;;  %s165_s20 = smov 8  }
  0x12   :  { %21 = dma.hbm_to_vmem [thread:$0]  %s219_s0, 256, %s16_s10, [#allocation3], %s164_s19, %s164_s19, %s165_s20  }
  0x13   :  { %s166_s23 = smov [#allocation5]   ;;  %s113_s27 = scalar_lea.hbm %s220_s1, 256 }
  0x14   :  { %s27_s24 = sshll.u32 %s166_s23, 4  ;;  %p114_p8 = scmp.ne.s32.totalorder %s220_s1, %s113_s27  ;;  %s28_s24 = int_to_ptr.vmem [resolvable:$true] %s27_s24 }
  0x15   :  { %p117_p9 = scmp.lt.u32.totalorder %s113_s27, %s220_s1 }
  0x17   :  { %p119_p10 = pnand %p117_p9, %p114_p8 }
  0x19   :  { %122 = shalt.err (!%p119_p10)
}
  0x1a   :  { %s123_s4 = scalar_lea.vmem %s28_s24, 256  ;;  %p128_p12 = scmp.lt.s32.totalorder %s28_s24, %s28_s24 }
  0x1b   :  { %p124_p11 = scmp.ne.s32.totalorder %s28_s24, %s123_s4  ;;  %p129_p13 = scmp.lt.s32.totalorder %s123_s4, %s123_s4 }
  0x1d   :  { %p130_p0 = por %p129_p13, %p128_p12 }
  0x1f   :  { %p131_p1 = pnand %p130_p0, %p124_p11 }
  0x21   :  { %134 = shalt.err (!%p131_p1)
}
  0x22   :  { %33 = dma.hbm_to_vmem [thread:$0]  %s220_s1, 256, %s28_s24, [#allocation6], %s164_s19, %s164_s19, %s165_s20  }
  0x23   :  { %157 = dma.done.wait [#allocation3], 256  }
  0x24   :  { %158 = vsyncadd [#allocation3], 4294967040 }
  0x25   :  { %159 = dma.done.wait [#allocation6], 256  }
  0x26   :  { %160 = vsyncadd [#allocation6], 4294967040  ;;  %v40_v0 = vld [vmem:[#allocation2] sm:$0xff]  ;;  %v41_v1 = vld [vmem:[#allocation2 + $0x8] sm:$0xff]  ;;  %s167_s1 = smov [#allocation7]  }
  0x27   :  { %v42_v2 = vld [vmem:[#allocation5] sm:$0xff]  ;;  %v43_v3 = vld [vmem:[#allocation5 + $0x8] sm:$0xff]  ;;  %s72_s6 = sshll.u32 %s167_s1, 4  ;;  %s73_s6 = int_to_ptr.vmem [resolvable:$true] %s72_s6 }
  0x28   :  { %v44_v4 = vsub.f32 %v40_v0, %v42_v2  ;;  %v45_v5 = vsub.f32 %v41_v1, %v43_v3  ;;  %s135_s7 = scalar_lea.vmem %s73_s6, 128  ;;  %p140_p3 = scmp.lt.s32.totalorder %s73_s6, %s73_s6 }
  0x29   :  { %p136_p2 = scmp.ne.s32.totalorder %s73_s6, %s135_s7  ;;  %p141_p4 = scmp.lt.s32.totalorder %s135_s7, %s135_s7 }
  0x2a   :  { %v46_v6 = vmul.f32 %v44_v4, %v44_v4  ;;  %v47_v7 = vmul.f32 %v45_v5, %v45_v5 }
  0x2b   :  { %p142_p5 = por %p141_p4, %p140_p3 }
  0x2c   :  { %v48_v8 = vadd.f32 1e-06, %v46_v6  ;;  %v49_v9 = vadd.f32 1e-06, %v47_v7 }
  0x2d   :  { %p143_p6 = pnand %p142_p5, %p136_p2 }
  0x2e   :  { %87 = vrsqrt.f32 %v48_v8  ;;  %vm52_vm0 = vcmp.eq.f32.partialorder %v48_v8, inf  ;;  %v55_v11 = vand.u32 2147483648, %v48_v8  ;;  %vm54_vm1 = vcmp.eq.f32.partialorder %v48_v8, 0.0 }
  0x2f   :  { %89 = vrsqrt.f32 %v49_v9  ;;  %vm59_vm2 = vcmp.eq.f32.partialorder %v49_v9, inf  ;;  %v62_v14 = vand.u32 2147483648, %v49_v9  ;;  %vm61_vm3 = vcmp.eq.f32.partialorder %v49_v9, 0.0 }
  0x38   :  { %v88_v10 = vpop.eup %87 }
  0x39   :  { %v90_v12 = vpop.eup %89  ;;  %v51_v13 = vmul.f32 %v88_v10, %v48_v8 }
  0x3a   :  { %v58_v15 = vmul.f32 %v90_v12, %v49_v9 }
  0x3b   :  { %v53_v16 = vsel %vm52_vm0, %v48_v8, %v51_v13 }
  0x3c   :  { %v56_v17 = vsel %vm54_vm1, %v55_v11, %v53_v16  ;;  %v60_v18 = vsel %vm59_vm2, %v49_v9, %v58_v15 }
  0x3d   :  { %v63_v19 = vsel %vm61_vm3, %v62_v14, %v60_v18 }
  0x3e   :  { %v64_v20 = vadd.f32 %v63_v19, %v56_v17 }
  0x40   :  { %65 = vst [vmem:[#allocation7] sm:$0xff] %v64_v20 }
  0x41   :  { %146 = shalt.err (!%p143_p6)
}
  0x42   :  { %s147_s10 = scalar_lea.hbm %s221_s2, 128 }
  0x43   :  { %p148_p7 = scmp.ne.s32.totalorder %s221_s2, %s147_s10  ;;  %p151_p8 = scmp.lt.u32.totalorder %s147_s10, %s221_s2 }
  0x45   :  { %p153_p9 = pnand %p151_p8, %p148_p7 }
  0x47   :  { %156 = shalt.err (!%p153_p9)
}
  0x48   :  { %75 = dma.vmem_to_hbm [thread:$0]  %s73_s6, 128, %s221_s2, [#allocation4]  }
  0x49   :  { %161 = dma.done.wait [#allocation4], 128  }
  0x4a   :  { %162 = vsyncadd [#allocation4], 4294967168 }
  0x4b   :  { %79 = vsyncpa [#allocation3], 1 }
  0x4c   :  { %80 = vsyncpa [#allocation6], 1 }
  0x4d   :  { %81 = vsyncpa [#allocation4], 1 }

</bundles_post_ra>
